<compile_context>
chip_gen: v7x
topology: tpu7x:2x2x1
jax: 0.10.0
libtpu: 0.0.40
codegen_flags: <defaults>
</compile_context>

<pallas_src>
import functools

import jax
import jax.numpy as jnp
from jax.experimental import pallas as pl
from jax.experimental.pallas import tpu as pltpu


def _round_up(x: int, m: int) -> int:
    return (x + m - 1) // m * m


def _vmem_budget_bytes() -> int:
    """Conservative per-kernel VMEM budget that fits v5e/v6e/v7x."""
    cap = 64 * 1024 * 1024  # assume the smallest (v7x per-TC) if query fails
    try:
        cap = int(pltpu.get_tpu_info().vmem_capacity_bytes)
    except Exception:
        pass
    return min(int(0.65 * cap), 48 * 1024 * 1024)


def _pick_m_tile(M: int, tmax: int = 512) -> int:
    """Pick an M tile from {tmax, tmax/2, ..., 128} minimizing padding blow-up."""
    best_t, best_pad = tmax, _round_up(M, tmax) - M
    t = tmax // 2
    while t >= 128:
        pad = _round_up(M, t) - M
        if pad < best_pad:
            best_t, best_pad = t, pad
        t //= 2
    return best_t


# --------------------------------------------------------------------------
# Kernels
# --------------------------------------------------------------------------
def _fused_linear_relu_kernel(x_ref, w_ref, b_ref, o_ref):
    """Full-K block: one MXU matmul per output tile, bias+ReLU fused."""
    x = x_ref[...].astype(w_ref.dtype)  # in-kernel cast rides a free VPU slot
    y = jnp.dot(x, w_ref[...], preferred_element_type=jnp.float32)
    o_ref[...] = jnp.maximum(y + b_ref[...], 0.0).astype(o_ref.dtype)


def _ktiled_linear_relu_kernel(x_ref, w_ref, b_ref, o_ref, acc_ref):
    """K-tiled accumulator path for layers too big for a full-K block."""
    k = pl.program_id(2)
    part = jnp.dot(
        x_ref[...].astype(w_ref.dtype), w_ref[...],
        preferred_element_type=jnp.float32,
    )

    @pl.when(k == 0)
    def _first():
        # First-iteration overwrite: no separate zero-init store/read pass.
        acc_ref[...] = part

    @pl.when(k > 0)
    def _rest():
        acc_ref[...] += part

    @pl.when(k == pl.num_programs(2) - 1)
    def _epilogue():
        o_ref[...] = jnp.maximum(acc_ref[...] + b_ref[...], 0.0).astype(
            o_ref.dtype
        )


# --------------------------------------------------------------------------
# Wrappers
# --------------------------------------------------------------------------
def prepare_params(w, b, compute_dtype=jnp.bfloat16):
    """One-time weight prep: do this at module init, NOT per forward call.

    Casts W to the MXU compute dtype (bf16) and normalizes bias to (1, N) f32
    so the per-step forward never re-materializes the weights in HBM.
    """
    if b.ndim == 1:
        b = b[None, :]
    return w.astype(compute_dtype), b.astype(jnp.float32)


@functools.partial(
    jax.jit, static_argnames=("tm", "tn", "tk", "out_dtype")
)
def base_mlp_forward(x, w, b, *, tm=None, tn=None, tk=None, out_dtype=None):
    """relu(x @ w + b)  — the forward implied by BaseMLPNetwork's interface.

    x: (batch, input_dim) f32.   w: (input_dim, output_dim), ideally bf16 from
    prepare_params().   b: (output_dim,) or (1, output_dim).
    tm/tn/tk: optional tile overrides; leaving them all None selects the fused
    full-K path whenever the layer fits the VMEM budget (the common MLP case).
    """
    M, K = x.shape
    Kw, N = w.shape
    assert K == Kw, (K, Kw)
    if b.ndim == 1:
        b = b[None, :]
    assert b.shape == (1, N), b.shape
    b = b.astype(jnp.float32)  # epilogue runs on the f32 accumulator

    out_dtype = x.dtype if out_dtype is None else out_dtype
    budget = _vmem_budget_bytes()
    xsz = x.dtype.itemsize
    wsz = w.dtype.itemsize
    osz = jnp.dtype(out_dtype).itemsize

    # ---------------- Regime A: fused full-K path (typical MLP layer) ------
    if tm is None and tn is None and tk is None:
        tm_a = M if M <= 512 else _pick_m_tile(M, 512)
        Mp = M if tm_a == M else _round_up(M, tm_a)
        mb = Mp // tm_a

        tn_a, nb = N, 1
        # v7x megacore: when there is only one M block, split N so both
        # TensorCores get a parallel block of work.
        if mb == 1 and N >= 256 and N % 256 == 0:
            tn_a, nb = N // 2, 2

        footprint = 2 * (
            tm_a * K * xsz + K * tn_a * wsz + tm_a * tn_a * osz + tn_a * 4
        )
        if footprint <= budget:
            xp = x if Mp == M else jnp.pad(x, ((0, Mp - M), (0, 0)))
            out = pl.pallas_call(
                _fused_linear_relu_kernel,
                out_shape=jax.ShapeDtypeStruct((Mp, N), out_dtype),
                grid=(mb, nb),
                in_specs=[
                    pl.BlockSpec((tm_a, K), lambda i, j: (i, 0)),
                    pl.BlockSpec((K, tn_a), lambda i, j: (0, j)),
                    pl.BlockSpec((1, tn_a), lambda i, j: (0, j)),
                ],
                out_specs=pl.BlockSpec((tm_a, tn_a), lambda i, j: (i, j)),
                compiler_params=pltpu.CompilerParams(
                    dimension_semantics=("parallel", "parallel"),
                    vmem_limit_bytes=budget,
                ),
            )(xp, w, b)
            return out if Mp == M else out[:M]

    # ---------------- Regime B: K/N-tiled accumulator path (large layers) --
    # TODO(synk): for very large layers, the per-call pad of W below should be
    # hoisted into prepare_params and cached by the caller.
    tm_b = 512 if tm is None else tm
    tn_b = 1024 if tn is None else tn
    tk_b = 1024 if tk is None else tk

    tm_b = min(tm_b, _round_up(M, 16))   # 16-row packing for bf16 operands
    tn_b = min(tn_b, _round_up(N, 128))  # lane-dense output
    tk_b = min(tk_b, _round_up(K, 128))

    def _footprint(tm_, tn_, tk_):
        return (2 * tm_ * tk_ * xsz + 2 * tk_ * tn_ * wsz
                + 2 * tm_ * tn_ * osz + tm_ * tn_ * 4 + 2 * tn_ * 4)

    def _shrink_lane(t):
        return max(128, (t // 2) // 128 * 128)

    for _ in range(16):
        if _footprint(tm_b, tn_b, tk_b) <= budget:
            break
        if tk_b > 128 and tk_b >= tn_b:
            tk_b = _shrink_lane(tk_b)
        elif tn_b > 128:
            tn_b = _shrink_lane(tn_b)
        elif tm_b > 16:
            tm_b = max(16, (tm_b // 2) // 8 * 8)
        else:
            break

    Mp = _round_up(M, tm_b)
    Np = _round_up(N, tn_b)
    Kp = _round_up(K, tk_b)

    xp = jnp.pad(x, ((0, Mp - M), (0, Kp - K)))
    wp = jnp.pad(w, ((0, Kp - K), (0, Np - N)))
    bp = jnp.pad(b, ((0, 0), (0, Np - N)))

    grid = (Mp // tm_b, Np // tn_b, Kp // tk_b)
    out = pl.pallas_call(
        _ktiled_linear_relu_kernel,
        out_shape=jax.ShapeDtypeStruct((Mp, Np), out_dtype),
        grid=grid,
        in_specs=[
            pl.BlockSpec((tm_b, tk_b), lambda i, j, k: (i, k)),
            pl.BlockSpec((tk_b, tn_b), lambda i, j, k: (k, j)),
            pl.BlockSpec((1, tn_b), lambda i, j, k: (0, j)),
        ],
        out_specs=pl.BlockSpec((tm_b, tn_b), lambda i, j, k: (i, j)),
        scratch_shapes=[pltpu.VMEM((tm_b, tn_b), jnp.float32)],
        compiler_params=pltpu.CompilerParams(
            dimension_semantics=("parallel", "parallel", "arbitrary"),
            vmem_limit_bytes=budget,
        ),
    )(xp, wp, bp)
    return out[:M, :N]


# --------------------------------------------------------------------------
# Self-test
# --------------------------------------------------------------------------
if __name__ == "__main__":
    key = jax.random.PRNGKey(0)

    def make(m, k, n, kk):
        kx, kw, kb = jax.random.split(kk, 3)
        x = jax.random.normal(kx, (m, k), dtype=jnp.float32)
        w = jax.random.normal(kw, (k, n), dtype=jnp.float32) / jnp.sqrt(k)
        b = jax.random.normal(kb, (n,), dtype=jnp.float32) * 0.01
        return x, w, b

    def reference(x, w, b):
        # Same bf16 rounding of the MXU operands; f32 accumulation both paths.
        xr = x.astype(jnp.bfloat16).astype(jnp.float32)
        wr = w.astype(jnp.bfloat16).astype(jnp.float32)
        return jnp.maximum(xr @ wr + b[None, :], 0.0)

    k1, k2, k3 = jax.random.split(key, 3)

    # 1) Typical small MLP layer -> fused full-K path, zero padding anywhere.
    x, w, b = make(8, 32, 32, k1)
    w_p, b_p = prepare_params(w, b)  # one-time weight prep (not per call)
    out = jax.block_until_ready(base_mlp_forward(x, w_p, b_p))
    assert out.shape == (8, 32)
    err = float(jnp.max(jnp.abs(out - reference(x, w, b))))
    assert jnp.allclose(out, reference(x, w, b), atol=2e-2, rtol=2e-2), err

    # 2) K-tiled accumulator path (forced via tile override), exact tiling.
    x, w, b = make(128, 256, 384, k2)
    w_p, b_p = prepare_params(w, b)
    out = jax.block_until_ready(base_mlp_forward(x, w_p, b_p, tk=128))
    assert out.shape == (128, 384)
    err = float(jnp.max(jnp.abs(out - reference(x, w, b))))
    assert jnp.allclose(out, reference(x, w, b), atol=2e-2, rtol=2e-2), err

    # 3) K-tiled path with awkward shapes exercising M/N/K padding.
    x, w, b = make(100, 200, 150, k3)
    w_p, b_p = prepare_params(w, b)
    out = jax.block_until_ready(
        base_mlp_forward(x, w_p, b_p, tm=64, tn=128, tk=128)
    )
    assert out.shape == (100, 150)
    err = float(jnp.max(jnp.abs(out - reference(x, w, b))))
    assert jnp.allclose(out, reference(x, w, b), atol=2e-2, rtol=2e-2), err

    print("KERNEL_OK")
</pallas_src>

<mosaic_0001>
module attributes {stable_mosaic.version = 11 : i64} {
  func.func @_fused_linear_relu_kernel(%arg0: i32, %arg1: i32, %arg2: memref<8x32xf32, #tpu.memory_space<vmem>>, %arg3: memref<32x32xbf16, #tpu.memory_space<vmem>>, %arg4: memref<1x32xf32, #tpu.memory_space<vmem>>, %arg5: memref<8x32xf32, #tpu.memory_space<vmem>>) attributes {dimension_semantics = [#tpu.dimension_semantics<parallel>, #tpu.dimension_semantics<parallel>], iteration_bounds = array<i64: 1, 1>, scalar_prefetch = 0 : i64, scratch_operands = 0 : i64, tpu.core_type = #tpu.core_type<tc>, window_params = [{transform_indices = @transform_0, window_bounds = array<i64: 8, 32>}, {transform_indices = @transform_1, window_bounds = array<i64: 32, 32>}, {transform_indices = @transform_2, window_bounds = array<i64: 1, 32>}, {transform_indices = @transform_3, window_bounds = array<i64: 8, 32>}]} {
    %c0 = arith.constant 0 : index
    %c0_0 = arith.constant 0 : index
    %0 = vector.load %arg2[%c0, %c0_0] : memref<8x32xf32, #tpu.memory_space<vmem>>, vector<8x32xf32>
    %1 = arith.truncf %0 : vector<8x32xf32> to vector<8x32xbf16>
    %c0_1 = arith.constant 0 : index
    %c0_2 = arith.constant 0 : index
    %2 = vector.load %arg3[%c0_1, %c0_2] : memref<32x32xbf16, #tpu.memory_space<vmem>>, vector<32x32xbf16>
    %cst = arith.constant dense<0.000000e+00> : vector<8x32xf32>
    %3 = tpu.matmul %1, %2, %cst {dimension_numbers = #tpu.dot_dimension_numbers<[1], [0], [0], [1], [0, 0, 1, 1], [], []>} : vector<8x32xbf16>, vector<32x32xbf16>, vector<8x32xf32> -> vector<8x32xf32>
    %c0_3 = arith.constant 0 : index
    %c0_4 = arith.constant 0 : index
    %4 = vector.load %arg4[%c0_3, %c0_4] : memref<1x32xf32, #tpu.memory_space<vmem>>, vector<1x32xf32>
    %5 = vector.broadcast %4 : vector<1x32xf32> to vector<8x32xf32>
    %6 = arith.addf %3, %5 : vector<8x32xf32>
    %cst_5 = arith.constant 0.000000e+00 : f32
    %7 = vector.broadcast %cst_5 : f32 to vector<8x32xf32>
    %8 = arith.maximumf %6, %7 : vector<8x32xf32>
    %c0_6 = arith.constant 0 : index
    %c0_7 = arith.constant 0 : index
    %9 = vector.load %arg5[%c0_6, %c0_7] : memref<8x32xf32, #tpu.memory_space<vmem>>, vector<8x32xf32>
    tpu.vector_store %arg5[%c0_6, %c0_7], %8 {strides = array<i32>} : memref<8x32xf32, #tpu.memory_space<vmem>>, vector<8x32xf32>,
    return
  }
  func.func @transform_0(%arg0: i32, %arg1: i32) -> (i32, i32) {
    %c0_i32 = arith.constant 0 : i32
    %c0_i32_0 = arith.constant 0 : i32
    return %arg0, %c0_i32 : i32, i32
  }
  func.func @transform_1(%arg0: i32, %arg1: i32) -> (i32, i32) {
    %c0_i32 = arith.constant 0 : i32
    %c0_i32_0 = arith.constant 0 : i32
    return %c0_i32, %arg1 : i32, i32
  }
  func.func @transform_2(%arg0: i32, %arg1: i32) -> (i32, i32) {
    %c0_i32 = arith.constant 0 : i32
    %c0_i32_0 = arith.constant 0 : i32
    return %c0_i32, %arg1 : i32, i32
  }
  func.func @transform_3(%arg0: i32, %arg1: i32) -> (i32, i32) {
    %c0_i32 = arith.constant 0 : i32
    return %arg0, %arg1 : i32, i32
  }
}

</mosaic_0001>

<bundles_post_ra>
// kernel: base_mlp_forward.1
= control target key start
LH: loop header
LB: loop body
LE: loop exit
PB: predicated region body
PF: predicated region fallthrough
CT: control target
= control target key end

     0   :  { %8 = vsyncpa [#allocation3], 0  ;;  %s298_s0 = inlined_call_operand.hbm [shape: f32[8,32], index: 0, kind: input, shape index: {}]   ;;  %s299_s1 = inlined_call_operand.hbm [shape: bf16[32,32], index: 1, kind: input, shape index: {}]   ;;  %s300_s2 = inlined_call_operand.vmem [shape: f32[1,32], index: 2, kind: input, shape index: {}]   ;;  %s301_s3 = inlined_call_operand.hbm [shape: f32[8,32], index: 3, kind: output, shape index: {}]  }
   0x1   :  { %9 = vsyncpa [#allocation6], 0 }
   0x2   :  { %10 = vsyncpa [#allocation4], 0  ;;  %s225_s12 = smov [#allocation2]   ;;  %s226_s14 = smov [#allocation5]  }
   0x3   :  { %s17_s13 = sshll.u32 %s225_s12, 4  ;;  %s26_s15 = sshll.u32 %s226_s14, 4  ;;  %s18_s13 = int_to_ptr.vmem [resolvable:$true] %s17_s13  ;;  %s252_s15 = int_to_ptr.vmem [resolvable:$true] %s26_s15 }
   0x4   :  { %s153_s18 = scalar_lea.hbm %s298_s0, 128 }
   0x5   :  { %p154_p0 = scmp.ne.s32.totalorder %s298_s0, %s153_s18  ;;  %p157_p1 = scmp.lt.u32.totalorder %s153_s18, %s298_s0 }
   0x7   :  { %p159_p2 = pnand %p157_p1, %p154_p0 }
   0x9   :  { %162 = shalt.err (!%p159_p2)
}
   0xa   :  { %s163_s23 = scalar_lea.vmem %s18_s13, 128  ;;  %p168_p4 = scmp.lt.s32.totalorder %s18_s13, %s18_s13 }
   0xb   :  { %p164_p3 = scmp.ne.s32.totalorder %s18_s13, %s163_s23  ;;  %p169_p5 = scmp.lt.s32.totalorder %s163_s23, %s163_s23 }
   0xd   :  { %p170_p6 = por %p169_p5, %p168_p4 }
   0xf   :  { %p171_p7 = pnand %p170_p6, %p164_p3 }
  0x11   :  { %174 = shalt.err (!%p171_p7)
}
  0x12   :  { %20 = dma.hbm_to_vmem [thread:$0]  %s298_s0, 128, %s18_s13, [#allocation3]  }
  0x13   :  { %s175_s28 = scalar_lea.hbm %s299_s1, 256 }
  0x14   :  { %p176_p8 = scmp.ne.s32.totalorder %s299_s1, %s175_s28  ;;  %p179_p9 = scmp.lt.u32.totalorder %s175_s28, %s299_s1 }
  0x16   :  { %p181_p10 = pnand %p179_p9, %p176_p8 }
  0x18   :  { %184 = shalt.err (!%p181_p10)
}
  0x19   :  { %s185_s6 = scalar_lea.vmem %s252_s15, 256  ;;  %p190_p12 = scmp.lt.s32.totalorder %s252_s15, %s252_s15 }
  0x1a   :  { %p186_p11 = scmp.ne.s32.totalorder %s252_s15, %s185_s6  ;;  %p191_p13 = scmp.lt.s32.totalorder %s185_s6, %s185_s6 }
  0x1c   :  { %p192_p0 = por %p191_p13, %p190_p12 }
  0x1e   :  { %p193_p1 = pnand %p192_p0, %p186_p11 }
  0x20   :  { %196 = shalt.err (!%p193_p1)
}
  0x21   :  { %s227_s0 = smov 64   ;;  %s228_s7 = smov 4  }
  0x22   :  { %32 = dma.hbm_to_vmem [thread:$0]  %s299_s1, 256, %s252_s15, [#allocation6], %s227_s0, %s227_s0, %s228_s7  }
  0x23   :  { %219 = dma.done.wait [#allocation3], 128  }
  0x24   :  { %220 = vsyncadd [#allocation3], 4294967168 }
  0x25   :  { %221 = dma.done.wait [#allocation6], 256  }
  0x26   :  { %222 = vsyncadd [#allocation6], 4294967040  ;;  %v229_v0 = vmov 0.0   ;;  %vm230_vm0 = vmmov 0   ;;  %v151_v1 = vld [vmem:[#allocation5] sm:$0xff]   ;;  %v152_v2 = vld [vmem:[#allocation5 + $0x8] sm:$0xff]  }
  0x27   :  { %136 = vmatprep.subr.bf16.mxu0 %v229_v0  ;;  %140 = vmatprep.mubr.msk.bf16.mxu0 %vm230_vm0, %v229_v0  ;;  %v42_v3 = vld [vmem:[#allocation2] sm:$0xff]  ;;  %vm67_vm1 = vcmask 261120   ;;  %s231_s1 = smov [#allocation7]  }
  0x28   :  { %137 = vmatpush3.bf16.msra.mxu0 %v151_v1  ;;  %v43_v4 = vpack.c.bf16 %v42_v3, %v42_v3  ;;  %v129_v5 = vld [vmem:[%s300_s2] ss:$0 sm:$0xff]  ;;  %s119_s12 = sshll.u32 %s231_s1, 4  ;;  %s120_s12 = int_to_ptr.vmem [resolvable:$true] %s119_s12 }
  0x29   :  { %138 = vmatprep.subr.bf16.mxu0 %v229_v0  ;;  %s197_s13 = scalar_lea.vmem %s120_s12, 128  ;;  %p202_p3 = scmp.lt.s32.totalorder %s120_s12, %s120_s12 }
  0x2a   :  { %p198_p2 = scmp.ne.s32.totalorder %s120_s12, %s197_s13  ;;  %p203_p4 = scmp.lt.s32.totalorder %s197_s13, %s197_s13 }
  0x2c   :  { %139 = vmatpush3.bf16.msra.mxu0 %v152_v2  ;;  %p204_p5 = por %p203_p4, %p202_p3 }
  0x2e   :  { %p205_p6 = pnand %p204_p5, %p198_p2 }
  0x2f   :  { %141 = vmatmul.mubr.msk.bf16.vlgmr.msra.gmra.mrb[0].mxu0 %vm67_vm1, %v43_v4 }
 0x102   :  { %v105_v6 = vpop.f32.mrb[0].mxu0 }
 0x103   :  { %v106_v7 = vadd.f32 %v129_v5, %v105_v6  ;;  %v142_v8 = vpop.f32.mrb[1].mxu0 }
 0x104   :  { %v108_v9 = vpop.f32.mrb[2].mxu0 }
 0x105   :  { %v111_v10 = vmax.f32 %v106_v7, 0.0  ;;  %v143_v11 = vpop.f32.mrb[3].mxu0 }
 0x107   :  { %112 = vst.msk [vmem:[#allocation7] sm:$0xff] %vm67_vm1, %v111_v10 }
 0x108   :  { %208 = shalt.err (!%p205_p6)
}
 0x109   :  { %s209_s2 = scalar_lea.hbm %s301_s3, 128 }
 0x10a   :  { %p210_p7 = scmp.ne.s32.totalorder %s301_s3, %s209_s2  ;;  %p213_p8 = scmp.lt.u32.totalorder %s209_s2, %s301_s3 }
 0x10c   :  { %p215_p9 = pnand %p213_p8, %p210_p7 }
 0x10e   :  { %218 = shalt.err (!%p215_p9)
}
 0x10f   :  { %122 = dma.vmem_to_hbm [thread:$0]  %s120_s12, 128, %s301_s3, [#allocation4]  }
 0x110   :  { %223 = dma.done.wait [#allocation4], 128  }
 0x111   :  { %224 = vsyncadd [#allocation4], 4294967168 }
 0x112   :  { %126 = vsyncpa [#allocation3], 1 }
 0x113   :  { %127 = vsyncpa [#allocation6], 1 }
 0x114   :  { %128 = vsyncpa [#allocation4], 1 }

</bundles_post_ra>
